<compile_context>
chip_gen: v7x
topology: tpu7x:2x2x1
jax: 0.10.0
libtpu: 0.0.40
codegen_flags: <defaults>
</compile_context>

<pallas_src>
import jax
import jax.numpy as jnp
from jax.experimental import pallas as pl
from jax.experimental.pallas import tpu as pltpu


def _round_up(x: int, m: int) -> int:
    return (x + m - 1) // m * m


def mlp_kernel(x_ref, w1_ref, b1_ref, w2_ref, b2_ref, o_ref):
    # Hidden layer: (TB, F)bf16 @ (F, Hp)bf16 -> f32 acc on MXU, then bias + ReLU on VPU.
    h = jnp.dot(x_ref[...], w1_ref[...], preferred_element_type=jnp.float32)
    h = jnp.maximum(h + b1_ref[...], 0.0)            # (1, Hp) bias broadcasts over batch
    # Output layer: cast activations to bf16 for the second MXU pass, accumulate f32.
    y = jnp.dot(h.astype(w2_ref.dtype), w2_ref[...],
                preferred_element_type=jnp.float32)
    o_ref[...] = (y + b2_ref[...]).astype(o_ref.dtype)


def net_forward(x, w1, b1, w2, b2, *, tb=128):
    """x: (B, n_feature) f32; w1: (F, H); b1: (1, H); w2: (H, O); b2: (1, O).
    Returns (B, n_output) f32."""
    B, F = x.shape
    H = w1.shape[1]
    O = w2.shape[1]

    # Pad hidden/output to lane-dense multiples of 128; pad batch to the tile size.
    H_pad = _round_up(H, 128)
    O_pad = _round_up(O, 128)
    tb = min(tb, _round_up(B, 8))          # don't over-pad tiny batches
    B_pad = _round_up(B, tb)

    x_p = jnp.pad(x, ((0, B_pad - B), (0, 0))).astype(jnp.bfloat16)
    w1_p = jnp.pad(w1, ((0, 0), (0, H_pad - H))).astype(jnp.bfloat16)
    b1_p = jnp.pad(b1, ((0, 0), (0, H_pad - H)))                     # f32
    w2_p = jnp.pad(w2, ((0, H_pad - H), (0, O_pad - O))).astype(jnp.bfloat16)
    b2_p = jnp.pad(b2, ((0, 0), (0, O_pad - O)))                     # f32

    grid = (B_pad // tb,)

    out = pl.pallas_call(
        mlp_kernel,
        out_shape=jax.ShapeDtypeStruct((B_pad, O_pad), jnp.float32),
        grid_spec=pltpu.PrefetchScalarGridSpec(
            num_scalar_prefetch=0,
            grid=grid,
            in_specs=[
                pl.BlockSpec((tb, F), lambda i: (i, 0)),          # x tile, pipelined
                pl.BlockSpec((F, H_pad), lambda i: (0, 0)),       # weights stay resident
                pl.BlockSpec((1, H_pad), lambda i: (0, 0)),
                pl.BlockSpec((H_pad, O_pad), lambda i: (0, 0)),
                pl.BlockSpec((1, O_pad), lambda i: (0, 0)),
            ],
            out_specs=pl.BlockSpec((tb, O_pad), lambda i: (i, 0)),
        ),
        compiler_params=pltpu.CompilerParams(
            # Batch tiles are independent -> let Mosaic shard across TensorCores (v7x).
            dimension_semantics=("parallel",),
        ),
    )(x_p, w1_p, b1_p, w2_p, b2_p)

    return out[:B, :O]


def init_params(key, n_feature, n_hidden, n_output):
    """Deterministic init mimicking torch.nn.Linear (uniform(-1/sqrt(fan_in), +))."""
    k1, k2, k3, k4 = jax.random.split(key, 4)
    bound1 = 1.0 / jnp.sqrt(n_feature)
    bound2 = 1.0 / jnp.sqrt(n_hidden)
    # Stored as (in, out) so the kernel computes x @ W directly.
    w1 = jax.random.uniform(k1, (n_feature, n_hidden), jnp.float32, -bound1, bound1)
    b1 = jax.random.uniform(k2, (1, n_hidden), jnp.float32, -bound1, bound1)
    w2 = jax.random.uniform(k3, (n_hidden, n_output), jnp.float32, -bound2, bound2)
    b2 = jax.random.uniform(k4, (1, n_output), jnp.float32, -bound2, bound2)
    return w1, b1, w2, b2


if __name__ == "__main__":
    # Small shapes consistent with the module; batch big enough to exercise tiling.
    n_feature, n_hidden, n_output = 32, 64, 16
    batch = 512  # -> 4 batch tiles of 128 rows each

    key = jax.random.PRNGKey(0)
    key_x, key_p = jax.random.split(key)
    x = jax.random.normal(key_x, (batch, n_feature), dtype=jnp.float32)
    w1, b1, w2, b2 = init_params(key_p, n_feature, n_hidden, n_output)

    out = net_forward(x, w1, b1, w2, b2)
    out = jax.block_until_ready(out)

    # Pure-JAX reference using the same bf16-operand / f32-accumulate math.
    x_bf, w1_bf, w2_bf = (x.astype(jnp.bfloat16), w1.astype(jnp.bfloat16),
                          w2.astype(jnp.bfloat16))
    h_ref = jnp.maximum(
        jnp.dot(x_bf, w1_bf, preferred_element_type=jnp.float32) + b1, 0.0)
    ref = jnp.dot(h_ref.astype(jnp.bfloat16), w2_bf,
                  preferred_element_type=jnp.float32) + b2

    assert out.shape == (batch, n_output)
    assert jnp.allclose(out, ref, atol=1e-2, rtol=1e-2)

    print("KERNEL_OK")
</pallas_src>

<mosaic_0001>
module attributes {stable_mosaic.version = 11 : i64} {
  func.func @mlp_kernel(%arg0: i32, %arg1: memref<128x32xbf16, #tpu.memory_space<vmem>>, %arg2: memref<32x128xbf16, #tpu.memory_space<vmem>>, %arg3: memref<1x128xf32, #tpu.memory_space<vmem>>, %arg4: memref<128x128xbf16, #tpu.memory_space<vmem>>, %arg5: memref<1x128xf32, #tpu.memory_space<vmem>>, %arg6: memref<128x128xf32, #tpu.memory_space<vmem>>) attributes {dimension_semantics = [#tpu.dimension_semantics<parallel>], iteration_bounds = array<i64: 4>, scalar_prefetch = 0 : i64, scratch_operands = 0 : i64, tpu.core_type = #tpu.core_type<tc>, window_params = [{transform_indices = @transform_0, window_bounds = array<i64: 128, 32>}, {pipeline_mode = #tpu.pipeline_mode<synchronous>, transform_indices = @transform_1, window_bounds = array<i64: 32, 128>}, {pipeline_mode = #tpu.pipeline_mode<synchronous>, transform_indices = @transform_2, window_bounds = array<i64: 1, 128>}, {pipeline_mode = #tpu.pipeline_mode<synchronous>, transform_indices = @transform_3, window_bounds = array<i64: 128, 128>}, {pipeline_mode = #tpu.pipeline_mode<synchronous>, transform_indices = @transform_4, window_bounds = array<i64: 1, 128>}, {transform_indices = @transform_5, window_bounds = array<i64: 128, 128>}]} {
    %c0 = arith.constant 0 : index
    %c0_0 = arith.constant 0 : index
    %0 = vector.load %arg1[%c0, %c0_0] : memref<128x32xbf16, #tpu.memory_space<vmem>>, vector<128x32xbf16>
    %c0_1 = arith.constant 0 : index
    %c0_2 = arith.constant 0 : index
    %1 = vector.load %arg2[%c0_1, %c0_2] : memref<32x128xbf16, #tpu.memory_space<vmem>>, vector<32x128xbf16>
    %cst = arith.constant dense<0.000000e+00> : vector<128x128xf32>
    %2 = tpu.matmul %0, %1, %cst {dimension_numbers = #tpu.dot_dimension_numbers<[1], [0], [0], [1], [0, 0, 1, 1], [], []>} : vector<128x32xbf16>, vector<32x128xbf16>, vector<128x128xf32> -> vector<128x128xf32>
    %c0_3 = arith.constant 0 : index
    %c0_4 = arith.constant 0 : index
    %3 = vector.load %arg3[%c0_3, %c0_4] : memref<1x128xf32, #tpu.memory_space<vmem>>, vector<1x128xf32>
    %4 = vector.broadcast %3 : vector<1x128xf32> to vector<128x128xf32>
    %5 = arith.addf %2, %4 : vector<128x128xf32>
    %cst_5 = arith.constant 0.000000e+00 : f32
    %6 = vector.broadcast %cst_5 : f32 to vector<128x128xf32>
    %7 = arith.maximumf %5, %6 : vector<128x128xf32>
    %8 = arith.truncf %7 : vector<128x128xf32> to vector<128x128xbf16>
    %c0_6 = arith.constant 0 : index
    %c0_7 = arith.constant 0 : index
    %9 = vector.load %arg4[%c0_6, %c0_7] : memref<128x128xbf16, #tpu.memory_space<vmem>>, vector<128x128xbf16>
    %cst_8 = arith.constant dense<0.000000e+00> : vector<128x128xf32>
    %10 = tpu.matmul %8, %9, %cst_8 {dimension_numbers = #tpu.dot_dimension_numbers<[1], [0], [0], [1], [0, 0, 1, 1], [], []>} : vector<128x128xbf16>, vector<128x128xbf16>, vector<128x128xf32> -> vector<128x128xf32>
    %c0_9 = arith.constant 0 : index
    %c0_10 = arith.constant 0 : index
    %11 = vector.load %arg5[%c0_9, %c0_10] : memref<1x128xf32, #tpu.memory_space<vmem>>, vector<1x128xf32>
    %12 = vector.broadcast %11 : vector<1x128xf32> to vector<128x128xf32>
    %13 = arith.addf %10, %12 : vector<128x128xf32>
    %c0_11 = arith.constant 0 : index
    %c0_12 = arith.constant 0 : index
    %14 = vector.load %arg6[%c0_11, %c0_12] : memref<128x128xf32, #tpu.memory_space<vmem>>, vector<128x128xf32>
    tpu.vector_store %arg6[%c0_11, %c0_12], %13 {strides = array<i32>} : memref<128x128xf32, #tpu.memory_space<vmem>>, vector<128x128xf32>,
    return
  }
  func.func @transform_0(%arg0: i32) -> (i32, i32) {
    %c0_i32 = arith.constant 0 : i32
    %c0_i32_0 = arith.constant 0 : i32
    return %arg0, %c0_i32 : i32, i32
  }
  func.func @transform_1(%arg0: i32) -> (i32, i32) {
    %c0_i32 = arith.constant 0 : i32
    %c0_i32_0 = arith.constant 0 : i32
    %c0_i32_1 = arith.constant 0 : i32
    return %c0_i32, %c0_i32_0 : i32, i32
  }
  func.func @transform_2(%arg0: i32) -> (i32, i32) {
    %c0_i32 = arith.constant 0 : i32
    %c0_i32_0 = arith.constant 0 : i32
    %c0_i32_1 = arith.constant 0 : i32
    return %c0_i32, %c0_i32_0 : i32, i32
  }
  func.func @transform_3(%arg0: i32) -> (i32, i32) {
    %c0_i32 = arith.constant 0 : i32
    %c0_i32_0 = arith.constant 0 : i32
    %c0_i32_1 = arith.constant 0 : i32
    return %c0_i32, %c0_i32_0 : i32, i32
  }
  func.func @transform_4(%arg0: i32) -> (i32, i32) {
    %c0_i32 = arith.constant 0 : i32
    %c0_i32_0 = arith.constant 0 : i32
    %c0_i32_1 = arith.constant 0 : i32
    return %c0_i32, %c0_i32_0 : i32, i32
  }
  func.func @transform_5(%arg0: i32) -> (i32, i32) {
    %c0_i32 = arith.constant 0 : i32
    %c0_i32_0 = arith.constant 0 : i32
    return %arg0, %c0_i32 : i32, i32
  }
}

</mosaic_0001>

<bundles_post_ra>
// kernel: tpu_custom_call.1
= control target key start
LH: loop header
LB: loop body
LE: loop exit
PB: predicated region body
PF: predicated region fallthrough
CT: control target
= control target key end

     0   :  { %10 = vsyncpa [#allocation3], 0  ;;  %s1182_s0 = inlined_call_operand.vmem [shape: bf16[512,32], index: 0, kind: input, shape index: {}]   ;;  %s1183_s1 = inlined_call_operand.vmem [shape: bf16[32,128], index: 1, kind: input, shape index: {}]   ;;  %s1184_s2 = inlined_call_operand.vmem [shape: f32[1,128], index: 2, kind: input, shape index: {}]   ;;  %s1185_s3 = inlined_call_operand.vmem [shape: bf16[128,128], index: 3, kind: input, shape index: {}]   ;;  %s1186_s4 = inlined_call_operand.vmem [shape: f32[1,128], index: 4, kind: input, shape index: {}]   ;;  %s1187_s5 = inlined_call_operand.hbm [shape: f32[512,128], index: 5, kind: output, shape index: {}]  }
   0x1   :  { %12 = vsyncpa [#allocation3 + $0x1], 0  ;;  %s1003_s18 = smov 0   ;;  %s1005_s19 = smov 0  }
   0x2   :  { %s1007_s20 = smov 0   ;;  %s1009_s21 = smov 0  }
   0x3 LB: > { %s1024_s22 = sadd.s32 4294967295, %s968_s21   ;;  %s712_s23 = sadd.s32 4294967294, %s968_s21   ;;  %s968_s21 = sphi %s1009_s21, %s1193_s21   ;;  %s964_s20 = sphi %s1007_s20, %s1192_s20   ;;  %s960_s19 = sphi %s1005_s19, %s1191_s19   ;;  %s956_s18 = sphi %s1003_s18, %s1190_s18  }
   0x4   : > { %s1028_s24 = sadd.s32 1, %s968_s21   ;;  %s135_s25 = sadd.s32 1, %s964_s20 }
   0x5   : > { %s132_s26 = ssub.s32 %s968_s21, %s1028_s24  ;;  %p145_p0 = scmp.ne.s32.totalorder %s964_s20, %s960_s19 }
   0x6   : > { %p133_p1 = scmp.eq.s32.totalorder %s132_s26, 0  ;;  %p146_p2 = scmp.eq.s32.totalorder %s1024_s22, 3 }
   0x7   : > { %p151_p3 = scmp.ne.s32.totalorder %s960_s19, %s956_s18  ;;  %p152_p4 = scmp.eq.s32.totalorder %s712_s23, 3 }
   0x8   : > { %s1039_s27 = scalar_select %p133_p1, %s964_s20, %s135_s25  }
   0x9   : > { %p1041_p5 = por %p146_p2, %p145_p0  ;;  %p1045_p6 = por %p152_p4, %p151_p3 }
   0xa   : > { %p715_p7 = scmp.ge.s32.totalorder %s968_s21, 1  ;;  %p191_p8 = scmp.lt.s32.totalorder %s968_s21, 5 }
   0xc   : > { %p192_p9 = pnand %p715_p7, %p191_p8 }
   0xd   : > { %v888_v0 = vld [vmem:[%s1183_s1] sm:$0xff] (!%p192_p9)   ;;  %s717_s7 = sshll.u32 (!%p192_p9), %s1024_s22, 4  ;;  %v889_v1 = vld [vmem:[%s1183_s1 + $0x8] sm:$0xff] (!%p192_p9)   ;;  %vm306_vm0 = vcmask (!%p192_p9), 261120   ;;  %v900_v4 = vld [vmem:[%s1185_s3 + $0x10] sm:$0xff] (!%p192_p9)   ;;  %s216_s16 = sand.u32 (!%p192_p9), 1, %s960_s19  }
   0xe   : > { %195 = sbr.rel (%p192_p9) target bundleno = 504 (0x1f8), region = 40  ;;  %p220_p10 = scmp.lt.s32.totalorder (!%p192_p9), %s717_s7, 63  ;;  %779 = vmatprep.subr.bf16.mxu0 (!%p192_p9), %v888_v0  ;;  %v898_v2 = vld [vmem:[%s1185_s3] sm:$0xff] (!%p192_p9)   ;;  %v899_v3 = vld [vmem:[%s1185_s3 + $0x8] sm:$0xff] (!%p192_p9)   ;;  %v901_v8 = vld [vmem:[%s1185_s3 + $0x18] sm:$0xff] (!%p192_p9)  }
   0xf   : > { %780 = vmatpush3.bf16.msra.mxu0 (!%p192_p9), %v888_v0  ;;  %831 = vmatprep.subr.bf16.mxu1 (!%p192_p9), %v898_v2  ;;  %v902_v10 = vld [vmem:[%s1185_s3 + $0x20] sm:$0xff] (!%p192_p9)   ;;  %v903_v12 = vld [vmem:[%s1185_s3 + $0x28] sm:$0xff] (!%p192_p9)   ;;  %v904_v16 = vld [vmem:[%s1185_s3 + $0x30] sm:$0xff] (!%p192_p9)   ;;  %s752_s30 = sshll.u32 (!%p192_p9), %s1024_s22, 11  ;;  %s1141_s22 = scalar_lea.sflag (!%p192_p9), [#allocation3], %s216_s16 }
  0x10   : > { %781 = vmatprep.subr.bf16.mxu0 (!%p192_p9), %v889_v1  ;;  %839 = vmatpush3.bf16.msra.mxu1 (!%p192_p9), %v898_v2  ;;  %v905_v17 = vld [vmem:[%s1185_s3 + $0x38] sm:$0xff] (!%p192_p9)   ;;  %v719_v18 = vld [vmem:[%s1184_s2] ss:$0 sm:$0xff] (!%p192_p9)  ;;  %s1132_s9 = scalar_lea.hbm (!%p192_p9), %s1187_s5, %s752_s30  ;;  %s970_s11 = smov (!%p192_p9), [#allocation2]  }
  0x11   : > { %832 = vmatprep.subr.bf16.mxu1 (!%p192_p9), %v899_v3  ;;  %s910_s12 = sshll.u32 (!%p192_p9), %s970_s11, 4  ;;  %s911_s12 = int_to_ptr.vmem [resolvable:$false] %s910_s12 }
  0x12   : > { %s912_s13 = scalar_lea.vmem (!%p192_p9), %s911_s12, 4096 }
  0x13   : > { %782 = vmatpush3.bf16.msra.mxu0 (!%p192_p9), %v889_v1 }
  0x14   : > { %799 = vmatprep.subr.bf16.mxu0 (!%p192_p9), %v898_v2  ;;  %840 = vmatpush3.bf16.msra.mxu1 (!%p192_p9), %v899_v3 }
  0x15   : > { %s1195_s7 = smov (!%p220_p10, %s717_s7), 63  ;;  %833 = vmatprep.subr.bf16.mxu1 %v900_v4 }
  0x16   : > { %s718_s14 = sshll.u32 %s1195_s7, 2 }
  0x17   : > { %s1067_s17 = scalar_lea.vmem %s1182_s0, %s718_s14 }
  0x18   : > { %v890_v5 = vld [vmem:[%s1067_s17] sm:$0xff]   ;;  %v891_v6 = vld [vmem:[%s1067_s17 + $0x8] sm:$0xff]   ;;  %v892_v7 = vld [vmem:[%s1067_s17 + $0x10] sm:$0xff]   ;;  %841 = vmatpush3.bf16.msra.mxu1 %v900_v4 }
  0x19   : > { %783 = vmatprep.mubr.msk.bf16.mxu0 %vm306_vm0, %v890_v5  ;;  %v893_v9 = vld [vmem:[%s1067_s17 + $0x18] sm:$0xff]   ;;  %834 = vmatprep.subr.bf16.mxu1 %v901_v8  ;;  %v894_v11 = vld [vmem:[%s1067_s17 + $0x20] sm:$0xff]   ;;  %v895_v13 = vld [vmem:[%s1067_s17 + $0x28] sm:$0xff]  }
  0x1a   : > { %784 = vmatmul.mubr.msk.bf16.vlgmr.msra.gmra.mrb[0].mxu0 %vm306_vm0, %v891_v6  ;;  %v896_v14 = vld [vmem:[%s1067_s17 + $0x30] sm:$0xff]   ;;  %v897_v15 = vld [vmem:[%s1067_s17 + $0x38] sm:$0xff]   ;;  %s716_s17 = sshll.u32 %s216_s16, 7 }
  0x1b   : > { %787 = vmatprep.mubr.msk.bf16.mxu0 %vm306_vm0, %v892_v7  ;;  %800 = vmatpush3.bf16.msra.mxu0 %v898_v2  ;;  %s1112_s26 = scalar_lea.vmem [#allocation2], %s716_s17 }
  0x1c   : > { %801 = vmatprep.subr.bf16.mxu0 %v899_v3  ;;  %842 = vmatpush3.bf16.msra.mxu1 %v901_v8  ;;  %s650_s6 = sshll.u32 %s1112_s26, 4  ;;  %s1134_s6 = int_to_ptr.vmem [resolvable:$true] %s650_s6 }
  0x1d   : > { %835 = vmatprep.subr.bf16.mxu1 %v902_v10  ;;  %s906_s10 = scalar_lea.vmem %s1134_s6, 2048  ;;  %p913_p0 = scmp.lt.s32.totalorder %s1134_s6, %s911_s12 }
  0x1e   : > { %p907_p11 = scmp.ne.s32.totalorder %s1134_s6, %s906_s10  ;;  %p914_p1 = scmp.lt.s32.totalorder %s912_s13, %s906_s10 }
  0x1f   : > { %802 = vmatpush3.bf16.msra.mxu0 %v899_v3 }
  0x20   : > { %803 = vmatprep.subr.bf16.mxu0 %v900_v4  ;;  %843 = vmatpush3.bf16.msra.mxu1 %v902_v10  ;;  %p908_p12 = pnand %p907_p11, %p1041_p5  ;;  %p915_p2 = por %p914_p1, %p913_p0 }
  0x21   : > { %836 = vmatprep.subr.bf16.mxu1 %v903_v12 }
  0x22   : > { %788 = vmatmul.mubr.msk.bf16.gmra.mrb[4].mxu0 %vm306_vm0, %v893_v9  ;;  %p909_p13 = pneg %p908_p12 }
  0x23   : > { %791 = vmatprep.mubr.msk.bf16.mxu0 %vm306_vm0, %v894_v11  ;;  %804 = vmatpush3.bf16.msra.mxu0 %v900_v4  ;;  %v738_v11 = vld [vmem:[%s1186_s4] ss:$0 sm:$0xff] }
  0x24   : > { %805 = vmatprep.subr.bf16.mxu0 %v901_v8  ;;  %844 = vmatpush3.bf16.msra.mxu1 %v903_v12  ;;  %p916_p3 = pnand %p915_p2, %p909_p13 }
  0x25   : > { %837 = vmatprep.subr.bf16.mxu1 %v904_v16 }
  0x27   : > { %806 = vmatpush3.bf16.msra.mxu0 %v901_v8 }
  0x28   : > { %807 = vmatprep.subr.bf16.mxu0 %v902_v10  ;;  %845 = vmatpush3.bf16.msra.mxu1 %v904_v16 }
  0x29   : > { %838 = vmatprep.subr.bf16.mxu1 %v905_v17 }
  0x2a   : > { %792 = vmatmul.mubr.msk.bf16.gmra.mrb[8].mxu0 %vm306_vm0, %v895_v13 }
  0x2b   : > { %795 = vmatprep.mubr.msk.bf16.mxu0 %vm306_vm0, %v896_v14  ;;  %808 = vmatpush3.bf16.msra.mxu0 %v902_v10 }
  0x2c   : > { %809 = vmatprep.subr.bf16.mxu0 %v903_v12  ;;  %846 = vmatpush3.bf16.msra.mxu1 %v905_v17 }
  0x2f   : > { %810 = vmatpush3.bf16.msra.mxu0 %v903_v12 }
  0x30   : > { %811 = vmatprep.subr.bf16.mxu0 %v904_v16 }
  0x32   : > { %796 = vmatmul.mubr.msk.bf16.gmra.mrb[12].mxu0 %vm306_vm0, %v897_v15 }
  0x33   : > { %812 = vmatpush3.bf16.msra.mxu0 %v904_v16 }
  0x34   : > { %813 = vmatprep.subr.bf16.mxu0 %v905_v17 }
  0x37   : > { %814 = vmatpush3.bf16.msra.mxu0 %v905_v17 }
  0xed   : > { %v785_v19 = vpop.f32.mrb[0].mxu0 }
  0xee   : > { %v374_v20 = vadd.f32 %v785_v19, %v719_v18  ;;  %v365_v21 = vpop.f32.mrb[1].mxu0 }
  0xef   : > { %v366_v22 = vadd.f32 %v719_v18, %v365_v21  ;;  %v786_v23 = vpop.f32.mrb[2].mxu0 }
  0xf0   : > { %v377_v24 = vadd.f32 %v786_v23, %v719_v18  ;;  %v368_v25 = vpop.f32.mrb[3].mxu0  ;;  %v430_v27 = vmax.f32 %v374_v20, 0.0 }
  0xf1   : > { %v369_v26 = vadd.f32 %v719_v18, %v368_v25  ;;  %v428_v29 = vmax.f32 %v366_v22, 0.0 }
  0xf2   : > { %v431_v28 = vmax.f32 %v377_v24, 0.0 }
  0xf3   : > { %v429_v30 = vmax.f32 %v369_v26, 0.0 }
  0xf4   : > { %v445_v31 = vpack.c.bf16 %v431_v28, %v430_v27 }
  0xf5   : > { %v444_v32 = vpack.c.bf16 %v429_v30, %v428_v29  ;;  %v789_v33 = vpop.f32.mrb[4].mxu0 }
  0xf6   : > { %v390_v34 = vadd.f32 %v789_v33, %v719_v18  ;;  %v381_v35 = vpop.f32.mrb[5].mxu0 }
  0xf7   : > { %v382_v36 = vadd.f32 %v719_v18, %v381_v35  ;;  %v790_v37 = vpop.f32.mrb[6].mxu0  ;;  %815 = vmatprep.mubr.bf16.mxu0 %v444_v32 }
  0xf8   : > { %v393_v38 = vadd.f32 %v790_v37, %v719_v18  ;;  %v384_v39 = vpop.f32.mrb[7].mxu0  ;;  %816 = vmatmul.mubr.bf16.vlgmr.msra.gmra.mrb[16].mxu0 %v445_v31  ;;  %v434_v41 = vmax.f32 %v390_v34, 0.0 }
  0xf9   : > { %v385_v40 = vadd.f32 %v719_v18, %v384_v39  ;;  %v432_v43 = vmax.f32 %v382_v36, 0.0 }
  0xfa   : > { %v435_v42 = vmax.f32 %v393_v38, 0.0 }
  0xfb   : > { %v433_v44 = vmax.f32 %v385_v40, 0.0 }
  0xfc   : > { %v447_v45 = vpack.c.bf16 %v435_v42, %v434_v41 }
  0xfd   : > { %v793_v46 = vpop.f32.mrb[8].mxu0  ;;  %v446_v47 = vpack.c.bf16 %v433_v44, %v432_v43 }
  0xfe   : > { %v406_v48 = vadd.f32 %v793_v46, %v719_v18  ;;  %v397_v49 = vpop.f32.mrb[9].mxu0 }
  0xff   : > { %v398_v50 = vadd.f32 %v719_v18, %v397_v49  ;;  %v794_v51 = vpop.f32.mrb[10].mxu0  ;;  %819 = vmatprep.mubr.bf16.mxu1 %v446_v47 }
 0x100   : > { %v409_v52 = vadd.f32 %v794_v51, %v719_v18  ;;  %v400_v53 = vpop.f32.mrb[11].mxu0  ;;  %820 = vmatmul.mubr.bf16.vlgmr.msra.gmra.mrb[0].mxu1 %v447_v45  ;;  %v438_v55 = vmax.f32 %v406_v48, 0.0 }
 0x101   : > { %v401_v54 = vadd.f32 %v719_v18, %v400_v53  ;;  %v436_v57 = vmax.f32 %v398_v50, 0.0 }
 0x102   : > { %v439_v56 = vmax.f32 %v409_v52, 0.0 }
 0x103   : > { %v437_v58 = vmax.f32 %v401_v54, 0.0 }
 0x104   : > { %v449_v59 = vpack.c.bf16 %v439_v56, %v438_v55 }
 0x105   : > { %v448_v60 = vpack.c.bf16 %v437_v58, %v436_v57  ;;  %v797_v61 = vpop.f32.mrb[12].mxu0 }
 0x106   : > { %v422_v62 = vadd.f32 %v797_v61, %v719_v18  ;;  %v413_v63 = vpop.f32.mrb[13].mxu0 }
 0x107   : > { %v414_v0 = vadd.f32 %v719_v18, %v413_v63  ;;  %v798_v1 = vpop.f32.mrb[14].mxu0  ;;  %823 = vmatprep.mubr.bf16.mxu1 %v448_v60 }
 0x108   : > { %v425_v2 = vadd.f32 %v798_v1, %v719_v18  ;;  %v416_v3 = vpop.f32.mrb[15].mxu0  ;;  %824 = vmatmul.mubr.bf16.gmra.mrb[4].mxu1 %v449_v59  ;;  %v442_v5 = vmax.f32 %v422_v62, 0.0 }
 0x109   : > { %v417_v4 = vadd.f32 %v719_v18, %v416_v3  ;;  %v440_v7 = vmax.f32 %v414_v0, 0.0 }
 0x10a   : > { %v443_v6 = vmax.f32 %v425_v2, 0.0 }
 0x10b   : > { %v441_v8 = vmax.f32 %v417_v4, 0.0 }
 0x10c   : > { %v451_v9 = vpack.c.bf16 %v443_v6, %v442_v5 }
 0x10d   : > { %v450_v10 = vpack.c.bf16 %v441_v8, %v440_v7 }
 0x10f   : > { %827 = vmatprep.mubr.bf16.mxu1 %v450_v10 }
 0x110   : > { %828 = vmatmul.mubr.bf16.gmra.mrb[8].mxu1 %v451_v9 }
 0x1cb   : > { %v817_v12 = vpop.f32.mrb[16].mxu0 }
 0x1cc   : > { %v566_v13 = vadd.f32 %v817_v12, %v738_v11  ;;  %v557_v14 = vpop.f32.mrb[17].mxu0 }
 0x1cd   : > { %v558_v15 = vadd.f32 %v738_v11, %v557_v14  ;;  %v818_v16 = vpop.f32.mrb[18].mxu0 }
 0x1ce   : > { %622 = vst [vmem:[%s1112_s26 + $0x10] sm:$0xff] %v566_v13  ;;  %v569_v17 = vadd.f32 %v818_v16, %v738_v11  ;;  %v560_v18 = vpop.f32.mrb[19].mxu0 }
 0x1cf   : > { %620 = vst [vmem:[%s1112_s26] sm:$0xff] %v558_v15  ;;  %v561_v19 = vadd.f32 %v738_v11, %v560_v18 }
 0x1d0   : > { %623 = vst [vmem:[%s1112_s26 + $0x18] sm:$0xff] %v569_v17 }
 0x1d1   : > { %621 = vst [vmem:[%s1112_s26 + $0x8] sm:$0xff] %v561_v19 }
 0x1d3   : > { %v821_v20 = vpop.f32.mrb[0].mxu1 }
 0x1d4   : > { %v582_v21 = vadd.f32 %v821_v20, %v738_v11  ;;  %v573_v22 = vpop.f32.mrb[1].mxu1 }
 0x1d5   : > { %v574_v23 = vadd.f32 %v738_v11, %v573_v22  ;;  %v822_v24 = vpop.f32.mrb[2].mxu1 }
 0x1d6   : > { %626 = vst [vmem:[%s1112_s26 + $0x30] sm:$0xff] %v582_v21  ;;  %v585_v25 = vadd.f32 %v822_v24, %v738_v11  ;;  %v576_v26 = vpop.f32.mrb[3].mxu1 }
 0x1d7   : > { %624 = vst [vmem:[%s1112_s26 + $0x20] sm:$0xff] %v574_v23  ;;  %v577_v27 = vadd.f32 %v738_v11, %v576_v26 }
 0x1d8   : > { %627 = vst [vmem:[%s1112_s26 + $0x38] sm:$0xff] %v585_v25 }
 0x1d9   : > { %625 = vst [vmem:[%s1112_s26 + $0x28] sm:$0xff] %v577_v27 }
 0x1db   : > { %v825_v28 = vpop.f32.mrb[4].mxu1 }
 0x1dc   : > { %v598_v29 = vadd.f32 %v825_v28, %v738_v11  ;;  %v589_v30 = vpop.f32.mrb[5].mxu1 }
 0x1dd   : > { %v590_v31 = vadd.f32 %v738_v11, %v589_v30  ;;  %v826_v32 = vpop.f32.mrb[6].mxu1 }
 0x1de   : > { %630 = vst [vmem:[%s1112_s26 + $0x50] sm:$0xff] %v598_v29  ;;  %v601_v33 = vadd.f32 %v826_v32, %v738_v11  ;;  %v592_v34 = vpop.f32.mrb[7].mxu1 }
 0x1df   : > { %628 = vst [vmem:[%s1112_s26 + $0x40] sm:$0xff] %v590_v31  ;;  %v593_v35 = vadd.f32 %v738_v11, %v592_v34 }
 0x1e0   : > { %631 = vst [vmem:[%s1112_s26 + $0x58] sm:$0xff] %v601_v33 }
 0x1e1   : > { %629 = vst [vmem:[%s1112_s26 + $0x48] sm:$0xff] %v593_v35 }
 0x1e3   : > { %v829_v36 = vpop.f32.mrb[8].mxu1 }
 0x1e4   : > { %v614_v37 = vadd.f32 %v829_v36, %v738_v11  ;;  %v605_v38 = vpop.f32.mrb[9].mxu1 }
 0x1e5   : > { %v606_v39 = vadd.f32 %v738_v11, %v605_v38  ;;  %v830_v40 = vpop.f32.mrb[10].mxu1 }
 0x1e6   : > { %634 = vst [vmem:[%s1112_s26 + $0x70] sm:$0xff] %v614_v37  ;;  %v617_v41 = vadd.f32 %v830_v40, %v738_v11  ;;  %v608_v42 = vpop.f32.mrb[11].mxu1 }
 0x1e7   : > { %632 = vst [vmem:[%s1112_s26 + $0x60] sm:$0xff] %v606_v39  ;;  %v609_v43 = vadd.f32 %v738_v11, %v608_v42 }
 0x1e8   : > { %635 = vst [vmem:[%s1112_s26 + $0x78] sm:$0xff] %v617_v41 }
 0x1e9   : > { %633 = vst [vmem:[%s1112_s26 + $0x68] sm:$0xff] %v609_v43 }
 0x1ea   : > { %919 = shalt.err (!%p916_p3)
}
 0x1eb   : > { %s920_s14 = scalar_lea.hbm %s1132_s9, 2048  ;;  %s924_s17 = scalar_lea.hbm %s1187_s5, 8192 }
 0x1ec   : > { %p921_p4 = scmp.ne.s32.totalorder %s1132_s9, %s920_s14  ;;  %p925_p9 = scmp.lt.u32.totalorder %s1132_s9, %s1187_s5 }
 0x1ed   : > { %p926_p10 = scmp.lt.u32.totalorder %s924_s17, %s920_s14  ;;  %p928_p12 = scmp.lt.u32.totalorder %s920_s14, %s1132_s9 }
 0x1ee   : > { %p922_p7 = pnand %p921_p4, %p1041_p5 }
 0x1ef   : > { %p927_p11 = por %p926_p10, %p925_p9 }
 0x1f0   : > { %p923_p8 = pneg %p922_p7 }
 0x1f1   : > { %p929_p13 = por %p928_p12, %p927_p11 }
 0x1f3   : > { %p930_p0 = pnand %p929_p13, %p923_p8 }
 0x1f5   : > { %933 = shalt.err (!%p930_p0)
}
 0x1f6   : > { %s971_s26 = smov 128   ;;  %s972_s30 = smov 8  }
 0x1f7   : > { %847 = dma.vmem_to_hbm [thread:$0]  (%p1041_p5), %s1134_s6, 2048, %s1132_s9, %s1141_s22, %s971_s26, %s971_s26, %s972_s30  }
 0x1f8 PF: > { %p853_p1 = scmp.ge.s32.totalorder %s968_s21, 2  ;;  %s665_s7 = sand.u32 1, %s956_s18  }
 0x1f9   : > { %s666_s8 = scalar_lea.sflag [#allocation3], %s665_s7 }
 0x1fa   : > { %p850_p2 = pnand %p853_p1, %p1045_p6 }
 0x1fc   : > { %951 = dma.done.wait (!%p850_p2), %s666_s8, 2048  }
 0x1fd   : > { %953 = vsyncadd (!%p850_p2), %s666_s8, 4294965248  ;;  %p15_p3 = scmp.ge.s32.totalorder %s1028_s24, 6   ;;  %s1190_s18 = smov %s960_s19 }
 0x1fe   : > { %s1191_s19 = smov %s964_s20  ;;  %s1192_s20 = smov %s1039_s27 }
 0x1ff   : > { %s1193_s21 = smov %s1028_s24  ;;  %17 = sbr.rel (!%p15_p3) target bundleno = 3 (0x3), region = 75 }
 0x206   :  { %671 = vsyncpa [#allocation3], 1 }
 0x207   :  { %673 = vsyncpa [#allocation3 + $0x1], 1 }

</bundles_post_ra>
